<compile_context>
chip_gen: v5e
topology: v5e:2x2
jax: 0.10.0
libtpu: 0.0.40
codegen_flags: <defaults>
</compile_context>

<pallas_src>
import numpy as np
import jax
import jax.numpy as jnp
from jax import lax
from jax.experimental import pallas as pl
from jax.experimental.pallas import tpu as pltpu


def make_fused_basic_block_kernel(H, W, B, Cin, C1, C2):
    HW = H * W
    BHW = B * HW

    def kernel(x_ref, w1_ref, w2_ref, b1_ref, b2_ref, m_ref, o_ref):
        # x_ref: (Cin, B*HW) -- channels on sublanes, batch*spatial on lanes
        # (lane-dense, BHW = 512 -> unmasked full-lane loads/stores).
        x = x_ref[...]                                           # (Cin, BHW)

        # ---- conv1x1 (bn1 scale folded into weights) + bias + relu ----
        h1 = jnp.dot(w1_ref[...], x, preferred_element_type=jnp.float32)
        h1 = jnp.maximum(h1 + b1_ref[...], 0.0)                  # (C1, BHW)

        # ---- conv3x3 pad=1 stride=1: 9 rolled/masked taps, 9 accumulating
        #      matmuls (no im2col concat -> no sublane relayout) ----
        masks = m_ref[...]                                       # (8, BHW)
        h2 = jnp.broadcast_to(b2_ref[...], (C2, BHW))            # bias-init acc
        mi = 0
        ti = 0
        for dy in (-1, 0, 1):
            for dx in (-1, 0, 1):
                sh = dy * W + dx                                 # flat shift
                # rolled[c, p] = h1[c, (p + sh) mod BHW]; out-of-image (and
                # wrap-around) positions are zeroed by the mask below.
                rolled = h1 if sh == 0 else pltpu.roll(
                    h1, shift=(-sh) % BHW, axis=1)
                if dy == 0 and dx == 0:
                    tap = rolled                                 # center: no mask
                else:
                    tap = rolled * masks[mi:mi + 1, :]
                    mi += 1
                h2 = h2 + jnp.dot(w2_ref[ti], tap,
                                  preferred_element_type=jnp.float32)
                ti += 1

        # ---- residual add + relu; lane-dense (C2, 512) unmasked store ----
        o_ref[...] = jnp.maximum(h2 + x, 0.0).astype(o_ref.dtype)

    return kernel


def fused_basic_block(x_nchw, w1, w2, bn1, bn2, eps=1e-5):
    """x_nchw: (B, Cin, H, W) float32.
       w1: (C1, Cin, 1, 1)  conv1x1 weight (PyTorch layout)
       w2: (C2, C1, 3, 3)   conv3x3 weight (PyTorch layout)
       bn1/bn2: dicts with gamma, beta, mean, var (per-channel)."""
    B, Cin, H, W = x_nchw.shape
    C1 = w1.shape[0]
    C2 = w2.shape[0]
    assert C2 == Cin, "downsample=None requires residual channel match"
    HW = H * W
    BHW = B * HW

    # --- glue (plain JAX, outside the kernel): layout + BN folding ---
    # (B, Cin, H, W) -> (Cin, B*HW): channels on sublanes, batch folded into lanes.
    x2d = jnp.transpose(x_nchw.reshape(B, Cin, HW), (1, 0, 2)) \
             .reshape(Cin, BHW).astype(jnp.float32)

    s1 = bn1["gamma"] / jnp.sqrt(bn1["var"] + eps)               # (C1,)
    b1 = (bn1["beta"] - bn1["mean"] * s1).reshape(C1, 1).astype(jnp.float32)
    s2 = bn2["gamma"] / jnp.sqrt(bn2["var"] + eps)               # (C2,)
    b2 = (bn2["beta"] - bn2["mean"] * s2).reshape(C2, 1).astype(jnp.float32)

    # conv1x1: (C1, Cin) with bn1 scale folded in
    w1_k = (w1[:, :, 0, 0] * s1[:, None]).astype(jnp.float32)
    # conv3x3: (C2, C1, 3, 3) -> (ky, kx, C2, C1) -> (9, C2, C1), bn2 scale folded;
    # tap index t = ky*3 + kx matches the kernel's (dy, dx) loop order.
    w2_k = (jnp.transpose(w2, (2, 3, 0, 1)).reshape(9, C2, C1)
            * s2[None, :, None]).astype(jnp.float32)

    # 8 per-image boundary masks for the non-center taps, built at trace time
    # with numpy (no in-kernel iota / div / mod work).  Lane index p:
    # b = p // HW, y = (p // W) % H, x = p % W.
    p = np.arange(BHW)
    yy = (p // W) % H
    xx = p % W
    rows = []
    for dy in (-1, 0, 1):
        for dx in (-1, 0, 1):
            if dy == 0 and dx == 0:
                continue
            valid = ((yy + dy >= 0) & (yy + dy < H)
                     & (xx + dx >= 0) & (xx + dx < W))
            rows.append(valid.astype(np.float32))
    masks = jnp.asarray(np.stack(rows, axis=0))                  # (8, BHW)

    kernel = make_fused_basic_block_kernel(H, W, B, Cin, C1, C2)

    vmem_spec = pl.BlockSpec(memory_space=pltpu.MemorySpace.VMEM)
    out2d = pl.pallas_call(
        kernel,
        out_shape=jax.ShapeDtypeStruct((C2, BHW), jnp.float32),
        in_specs=[vmem_spec] * 6,
        out_specs=vmem_spec,
    )(x2d, w1_k, w2_k, b1, b2, masks)

    # (C2, B*HW) -> (B, C2, H, W)
    return jnp.transpose(out2d.reshape(C2, B, H, W), (1, 0, 2, 3))


# --------- pure-JAX reference (for correctness check) ---------
def reference(x, w1, w2, bn1, bn2, eps=1e-5):
    dn = lax.conv_dimension_numbers(x.shape, w1.shape, ("NCHW", "OIHW", "NCHW"))

    def bn(h, p):
        s = p["gamma"] / jnp.sqrt(p["var"] + eps)
        b = p["beta"] - p["mean"] * s
        return h * s[None, :, None, None] + b[None, :, None, None]

    h = lax.conv_general_dilated(x, w1, (1, 1), "VALID", dimension_numbers=dn)
    h = jax.nn.relu(bn(h, bn1))
    h = lax.conv_general_dilated(h, w2, (1, 1), ((1, 1), (1, 1)),
                                 dimension_numbers=dn)
    h = bn(h, bn2)
    return jax.nn.relu(h + x)


if __name__ == "__main__":
    # Module hyperparams: in_planes = planes = 8, cprate = [0.0, 0.25, 0.0],
    # cur_convid = 1  ->  last_cout = 8, cur_cout1 = 6, cur_cout2 = 8,
    # stride = 1, downsample = None.
    B, Cin, H, W = 2, 8, 16, 16
    C1, C2 = 6, 8

    key = jax.random.PRNGKey(0)
    ks = jax.random.split(key, 10)
    x = jax.random.normal(ks[0], (B, Cin, H, W), jnp.float32)
    w1 = jax.random.normal(ks[1], (C1, Cin, 1, 1), jnp.float32) * 0.2
    w2 = jax.random.normal(ks[2], (C2, C1, 3, 3), jnp.float32) * 0.1
    bn1 = dict(gamma=jax.random.uniform(ks[3], (C1,), minval=0.5, maxval=1.5),
               beta=jax.random.normal(ks[4], (C1,)) * 0.1,
               mean=jax.random.normal(ks[5], (C1,)) * 0.1,
               var=jax.random.uniform(ks[6], (C1,), minval=0.5, maxval=1.5))
    bn2 = dict(gamma=jax.random.uniform(ks[7], (C2,), minval=0.5, maxval=1.5),
               beta=jax.random.normal(ks[8], (C2,)) * 0.1,
               mean=jax.random.normal(ks[9], (C2,)) * 0.1,
               var=jax.random.uniform(ks[3], (C2,), minval=0.5, maxval=1.5))

    out = fused_basic_block(x, w1, w2, bn1, bn2)
    out = jax.block_until_ready(out)

    ref = jax.block_until_ready(reference(x, w1, w2, bn1, bn2))
    assert out.shape == (B, C2, H, W)
    assert jnp.allclose(out, ref, atol=1e-4, rtol=1e-4), \
        f"max err {jnp.max(jnp.abs(out - ref))}"

    print("KERNEL_OK")
</pallas_src>

<mosaic_0001>
module attributes {stable_mosaic.version = 11 : i64} {
  func.func @kernel(%arg0: memref<8x512xf32, #tpu.memory_space<vmem>>, %arg1: memref<6x8xf32, #tpu.memory_space<vmem>>, %arg2: memref<9x8x6xf32, #tpu.memory_space<vmem>>, %arg3: memref<6x1xf32, #tpu.memory_space<vmem>>, %arg4: memref<8x1xf32, #tpu.memory_space<vmem>>, %arg5: memref<8x512xf32, #tpu.memory_space<vmem>>, %arg6: memref<8x512xf32, #tpu.memory_space<vmem>>) attributes {dimension_semantics = [], scalar_prefetch = 0 : i64, scratch_operands = 0 : i64, tpu.core_type = #tpu.core_type<tc>} {
    %c0 = arith.constant 0 : index
    %c0_0 = arith.constant 0 : index
    %0 = vector.load %arg0[%c0, %c0_0] : memref<8x512xf32, #tpu.memory_space<vmem>>, vector<8x512xf32>
    %c0_1 = arith.constant 0 : index
    %c0_2 = arith.constant 0 : index
    %1 = vector.load %arg1[%c0_1, %c0_2] : memref<6x8xf32, #tpu.memory_space<vmem>>, vector<6x8xf32>
    %cst = arith.constant dense<0.000000e+00> : vector<6x512xf32>
    %2 = tpu.matmul %1, %0, %cst {dimension_numbers = #tpu.dot_dimension_numbers<[1], [0], [0], [1], [0, 0, 1, 1], [], []>} : vector<6x8xf32>, vector<8x512xf32>, vector<6x512xf32> -> vector<6x512xf32>
    %c0_3 = arith.constant 0 : index
    %c0_4 = arith.constant 0 : index
    %3 = vector.load %arg3[%c0_3, %c0_4] : memref<6x1xf32, #tpu.memory_space<vmem>>, vector<6x1xf32>
    %4 = vector.broadcast %3 : vector<6x1xf32> to vector<6x512xf32>
    %5 = arith.addf %2, %4 : vector<6x512xf32>
    %cst_5 = arith.constant 0.000000e+00 : f32
    %6 = vector.broadcast %cst_5 : f32 to vector<6x512xf32>
    %7 = arith.maximumf %5, %6 : vector<6x512xf32>
    %c0_6 = arith.constant 0 : index
    %c0_7 = arith.constant 0 : index
    %8 = vector.load %arg5[%c0_6, %c0_7] : memref<8x512xf32, #tpu.memory_space<vmem>>, vector<8x512xf32>
    %c0_8 = arith.constant 0 : index
    %c0_9 = arith.constant 0 : index
    %9 = vector.load %arg4[%c0_8, %c0_9] : memref<8x1xf32, #tpu.memory_space<vmem>>, vector<8x1xf32>
    %10 = vector.shape_cast %9 : vector<8x1xf32> to vector<8x1xf32>
    %11 = vector.broadcast %10 : vector<8x1xf32> to vector<8x512xf32>
    %c17_i32 = arith.constant 17 : i32
    %12 = tpu.dynamic_rotate %7 by %c17_i32 dim 1 : vector<6x512xf32>, i32 -> vector<6x512xf32>
    %13 = vector.extract_strided_slice %8 {offsets = [0, 0], sizes = [1, 512], strides = [1, 1]} : vector<8x512xf32> to vector<1x512xf32>
    %14 = vector.broadcast %13 : vector<1x512xf32> to vector<6x512xf32>
    %15 = arith.mulf %12, %14 : vector<6x512xf32>
    %c0_10 = arith.constant 0 : index
    %c0_11 = arith.constant 0 : index
    %c0_12 = arith.constant 0 : index
    %16 = vector.load %arg2[%c0_10, %c0_11, %c0_12] : memref<9x8x6xf32, #tpu.memory_space<vmem>>, vector<1x8x6xf32>
    %17 = vector.shape_cast %16 : vector<1x8x6xf32> to vector<8x6xf32>
    %cst_13 = arith.constant dense<0.000000e+00> : vector<8x512xf32>
    %18 = tpu.matmul %17, %15, %cst_13 {dimension_numbers = #tpu.dot_dimension_numbers<[1], [0], [0], [1], [0, 0, 1, 1], [], []>} : vector<8x6xf32>, vector<6x512xf32>, vector<8x512xf32> -> vector<8x512xf32>
    %19 = arith.addf %11, %18 : vector<8x512xf32>
    %c16_i32 = arith.constant 16 : i32
    %20 = tpu.dynamic_rotate %7 by %c16_i32 dim 1 : vector<6x512xf32>, i32 -> vector<6x512xf32>
    %21 = vector.extract_strided_slice %8 {offsets = [1, 0], sizes = [1, 512], strides = [1, 1]} : vector<8x512xf32> to vector<1x512xf32>
    %22 = vector.broadcast %21 : vector<1x512xf32> to vector<6x512xf32>
    %23 = arith.mulf %20, %22 : vector<6x512xf32>
    %c1 = arith.constant 1 : index
    %c0_14 = arith.constant 0 : index
    %c0_15 = arith.constant 0 : index
    %24 = vector.load %arg2[%c1, %c0_14, %c0_15] : memref<9x8x6xf32, #tpu.memory_space<vmem>>, vector<1x8x6xf32>
    %25 = vector.shape_cast %24 : vector<1x8x6xf32> to vector<8x6xf32>
    %cst_16 = arith.constant dense<0.000000e+00> : vector<8x512xf32>
    %26 = tpu.matmul %25, %23, %cst_16 {dimension_numbers = #tpu.dot_dimension_numbers<[1], [0], [0], [1], [0, 0, 1, 1], [], []>} : vector<8x6xf32>, vector<6x512xf32>, vector<8x512xf32> -> vector<8x512xf32>
    %27 = arith.addf %19, %26 : vector<8x512xf32>
    %c15_i32 = arith.constant 15 : i32
    %28 = tpu.dynamic_rotate %7 by %c15_i32 dim 1 : vector<6x512xf32>, i32 -> vector<6x512xf32>
    %29 = vector.extract_strided_slice %8 {offsets = [2, 0], sizes = [1, 512], strides = [1, 1]} : vector<8x512xf32> to vector<1x512xf32>
    %30 = vector.broadcast %29 : vector<1x512xf32> to vector<6x512xf32>
    %31 = arith.mulf %28, %30 : vector<6x512xf32>
    %c2 = arith.constant 2 : index
    %c0_17 = arith.constant 0 : index
    %c0_18 = arith.constant 0 : index
    %32 = vector.load %arg2[%c2, %c0_17, %c0_18] : memref<9x8x6xf32, #tpu.memory_space<vmem>>, vector<1x8x6xf32>
    %33 = vector.shape_cast %32 : vector<1x8x6xf32> to vector<8x6xf32>
    %cst_19 = arith.constant dense<0.000000e+00> : vector<8x512xf32>
    %34 = tpu.matmul %33, %31, %cst_19 {dimension_numbers = #tpu.dot_dimension_numbers<[1], [0], [0], [1], [0, 0, 1, 1], [], []>} : vector<8x6xf32>, vector<6x512xf32>, vector<8x512xf32> -> vector<8x512xf32>
    %35 = arith.addf %27, %34 : vector<8x512xf32>
    %c1_i32 = arith.constant 1 : i32
    %36 = tpu.dynamic_rotate %7 by %c1_i32 dim 1 : vector<6x512xf32>, i32 -> vector<6x512xf32>
    %37 = vector.extract_strided_slice %8 {offsets = [3, 0], sizes = [1, 512], strides = [1, 1]} : vector<8x512xf32> to vector<1x512xf32>
    %38 = vector.broadcast %37 : vector<1x512xf32> to vector<6x512xf32>
    %39 = arith.mulf %36, %38 : vector<6x512xf32>
    %c3 = arith.constant 3 : index
    %c0_20 = arith.constant 0 : index
    %c0_21 = arith.constant 0 : index
    %40 = vector.load %arg2[%c3, %c0_20, %c0_21] : memref<9x8x6xf32, #tpu.memory_space<vmem>>, vector<1x8x6xf32>
    %41 = vector.shape_cast %40 : vector<1x8x6xf32> to vector<8x6xf32>
    %cst_22 = arith.constant dense<0.000000e+00> : vector<8x512xf32>
    %42 = tpu.matmul %41, %39, %cst_22 {dimension_numbers = #tpu.dot_dimension_numbers<[1], [0], [0], [1], [0, 0, 1, 1], [], []>} : vector<8x6xf32>, vector<6x512xf32>, vector<8x512xf32> -> vector<8x512xf32>
    %43 = arith.addf %35, %42 : vector<8x512xf32>
    %c4 = arith.constant 4 : index
    %c0_23 = arith.constant 0 : index
    %c0_24 = arith.constant 0 : index
    %44 = vector.load %arg2[%c4, %c0_23, %c0_24] : memref<9x8x6xf32, #tpu.memory_space<vmem>>, vector<1x8x6xf32>
    %45 = vector.shape_cast %44 : vector<1x8x6xf32> to vector<8x6xf32>
    %cst_25 = arith.constant dense<0.000000e+00> : vector<8x512xf32>
    %46 = tpu.matmul %45, %7, %cst_25 {dimension_numbers = #tpu.dot_dimension_numbers<[1], [0], [0], [1], [0, 0, 1, 1], [], []>} : vector<8x6xf32>, vector<6x512xf32>, vector<8x512xf32> -> vector<8x512xf32>
    %47 = arith.addf %43, %46 : vector<8x512xf32>
    %c511_i32 = arith.constant 511 : i32
    %48 = tpu.dynamic_rotate %7 by %c511_i32 dim 1 : vector<6x512xf32>, i32 -> vector<6x512xf32>
    %49 = vector.extract_strided_slice %8 {offsets = [4, 0], sizes = [1, 512], strides = [1, 1]} : vector<8x512xf32> to vector<1x512xf32>
    %50 = vector.broadcast %49 : vector<1x512xf32> to vector<6x512xf32>
    %51 = arith.mulf %48, %50 : vector<6x512xf32>
    %c5 = arith.constant 5 : index
    %c0_26 = arith.constant 0 : index
    %c0_27 = arith.constant 0 : index
    %52 = vector.load %arg2[%c5, %c0_26, %c0_27] : memref<9x8x6xf32, #tpu.memory_space<vmem>>, vector<1x8x6xf32>
    %53 = vector.shape_cast %52 : vector<1x8x6xf32> to vector<8x6xf32>
    %cst_28 = arith.constant dense<0.000000e+00> : vector<8x512xf32>
    %54 = tpu.matmul %53, %51, %cst_28 {dimension_numbers = #tpu.dot_dimension_numbers<[1], [0], [0], [1], [0, 0, 1, 1], [], []>} : vector<8x6xf32>, vector<6x512xf32>, vector<8x512xf32> -> vector<8x512xf32>
    %55 = arith.addf %47, %54 : vector<8x512xf32>
    %c497_i32 = arith.constant 497 : i32
    %56 = tpu.dynamic_rotate %7 by %c497_i32 dim 1 : vector<6x512xf32>, i32 -> vector<6x512xf32>
    %57 = vector.extract_strided_slice %8 {offsets = [5, 0], sizes = [1, 512], strides = [1, 1]} : vector<8x512xf32> to vector<1x512xf32>
    %58 = vector.broadcast %57 : vector<1x512xf32> to vector<6x512xf32>
    %59 = arith.mulf %56, %58 : vector<6x512xf32>
    %c6 = arith.constant 6 : index
    %c0_29 = arith.constant 0 : index
    %c0_30 = arith.constant 0 : index
    %60 = vector.load %arg2[%c6, %c0_29, %c0_30] : memref<9x8x6xf32, #tpu.memory_space<vmem>>, vector<1x8x6xf32>
    %61 = vector.shape_cast %60 : vector<1x8x6xf32> to vector<8x6xf32>
    %cst_31 = arith.constant dense<0.000000e+00> : vector<8x512xf32>
    %62 = tpu.matmul %61, %59, %cst_31 {dimension_numbers = #tpu.dot_dimension_numbers<[1], [0], [0], [1], [0, 0, 1, 1], [], []>} : vector<8x6xf32>, vector<6x512xf32>, vector<8x512xf32> -> vector<8x512xf32>
    %63 = arith.addf %55, %62 : vector<8x512xf32>
    %c496_i32 = arith.constant 496 : i32
    %64 = tpu.dynamic_rotate %7 by %c496_i32 dim 1 : vector<6x512xf32>, i32 -> vector<6x512xf32>
    %65 = vector.extract_strided_slice %8 {offsets = [6, 0], sizes = [1, 512], strides = [1, 1]} : vector<8x512xf32> to vector<1x512xf32>
    %66 = vector.broadcast %65 : vector<1x512xf32> to vector<6x512xf32>
    %67 = arith.mulf %64, %66 : vector<6x512xf32>
    %c7 = arith.constant 7 : index
    %c0_32 = arith.constant 0 : index
    %c0_33 = arith.constant 0 : index
    %68 = vector.load %arg2[%c7, %c0_32, %c0_33] : memref<9x8x6xf32, #tpu.memory_space<vmem>>, vector<1x8x6xf32>
    %69 = vector.shape_cast %68 : vector<1x8x6xf32> to vector<8x6xf32>
    %cst_34 = arith.constant dense<0.000000e+00> : vector<8x512xf32>
    %70 = tpu.matmul %69, %67, %cst_34 {dimension_numbers = #tpu.dot_dimension_numbers<[1], [0], [0], [1], [0, 0, 1, 1], [], []>} : vector<8x6xf32>, vector<6x512xf32>, vector<8x512xf32> -> vector<8x512xf32>
    %71 = arith.addf %63, %70 : vector<8x512xf32>
    %c495_i32 = arith.constant 495 : i32
    %72 = tpu.dynamic_rotate %7 by %c495_i32 dim 1 : vector<6x512xf32>, i32 -> vector<6x512xf32>
    %73 = vector.extract_strided_slice %8 {offsets = [7, 0], sizes = [1, 512], strides = [1, 1]} : vector<8x512xf32> to vector<1x512xf32>
    %74 = vector.broadcast %73 : vector<1x512xf32> to vector<6x512xf32>
    %75 = arith.mulf %72, %74 : vector<6x512xf32>
    %c8 = arith.constant 8 : index
    %c0_35 = arith.constant 0 : index
    %c0_36 = arith.constant 0 : index
    %76 = vector.load %arg2[%c8, %c0_35, %c0_36] : memref<9x8x6xf32, #tpu.memory_space<vmem>>, vector<1x8x6xf32>
    %77 = vector.shape_cast %76 : vector<1x8x6xf32> to vector<8x6xf32>
    %cst_37 = arith.constant dense<0.000000e+00> : vector<8x512xf32>
    %78 = tpu.matmul %77, %75, %cst_37 {dimension_numbers = #tpu.dot_dimension_numbers<[1], [0], [0], [1], [0, 0, 1, 1], [], []>} : vector<8x6xf32>, vector<6x512xf32>, vector<8x512xf32> -> vector<8x512xf32>
    %79 = arith.addf %71, %78 : vector<8x512xf32>
    %80 = arith.addf %79, %0 : vector<8x512xf32>
    %cst_38 = arith.constant 0.000000e+00 : f32
    %81 = vector.broadcast %cst_38 : f32 to vector<8x512xf32>
    %82 = arith.maximumf %80, %81 : vector<8x512xf32>
    %c0_39 = arith.constant 0 : index
    %c0_40 = arith.constant 0 : index
    %83 = vector.load %arg6[%c0_39, %c0_40] : memref<8x512xf32, #tpu.memory_space<vmem>>, vector<8x512xf32>
    tpu.vector_store %arg6[%c0_39, %c0_40], %82 {strides = array<i32>} : memref<8x512xf32, #tpu.memory_space<vmem>>, vector<8x512xf32>,
    return
  }
}

</mosaic_0001>

<bundles_post_ra>
// kernel: tpu_custom_call.1
= control target key start
LH: loop header
LB: loop body
LE: loop exit
PB: predicated region body
PF: predicated region fallthrough
CT: control target
= control target key end

     0   :  { %vm35_vm0 = vcmask 64512   ;;  %s1740_s0 = inlined_call_operand.vmem [shape: f32[8,512], index: 0, kind: input, shape index: {}]   ;;  %s1741_s1 = inlined_call_operand.vmem [shape: f32[6,8], index: 1, kind: input, shape index: {}]   ;;  %s1742_s2 = inlined_call_operand.vmem [shape: f32[9,8,6], index: 2, kind: input, shape index: {}]   ;;  %s1743_s3 = inlined_call_operand.vmem [shape: f32[6,1], index: 3, kind: input, shape index: {}]   ;;  %s1744_s4 = inlined_call_operand.vmem [shape: f32[8,1], index: 4, kind: input, shape index: {}]   ;;  %s1745_s5 = inlined_call_operand.vmem [shape: f32[8,512], index: 5, kind: input, shape index: {}]   ;;  %s1746_s6 = inlined_call_operand.hbm [shape: f32[8,512], index: 6, kind: output, shape index: {}]  }
   0x1   :  { %v1410_v0 = vld [vmem:[%s1740_s0] sm:$0xff]  ;;  %v1415_v1 = vld [vmem:[%s1740_s0 + $0x8] sm:$0xff]  ;;  %v1420_v2 = vld [vmem:[%s1740_s0 + $0x10] sm:$0xff] }
   0x2   :  { %54 = vmatpush.msra.mxu0 %v1410_v0  ;;  %74 = vmatpush.msra.mxu1 %v1415_v1  ;;  %v1427_v3 = vld [vmem:[%s1740_s0 + $0x18] sm:$0xff]  ;;  %v28_v4 = vld [vmem:[%s1741_s1] sm:$0x3f] }
   0x3   :  { %94 = vmatpush.msra.mxu2 %v1420_v2  ;;  %114 = vmatpush.msra.mxu3 %v1427_v3 }
   0x4   :  { %11 = vsyncpa [#allocation3], 0  ;;  %1241 = vmatmul.msk.f32.vlgmr.msra.gmra.mxu0 %vm35_vm0, %v28_v4  ;;  %1242 = vmatmul.msk.f32.vlgmr.msra.gmra.mxu1 %vm35_vm0, %v28_v4  ;;  %v29_v5 = vld [vmem:[%s1743_s3] sm:$0x3f]  ;;  %v1362_v6 = vmov 0   ;;  %s1363_s0 = smov 17   ;;  %v141_v23 = vlaneseq }
   0x5   :  { %1243 = vmatmul.msk.f32.vlgmr.msra.gmra.mxu2 %vm35_vm0, %v28_v4  ;;  %1244 = vmatmul.msk.f32.vlgmr.msra.gmra.mxu3 %vm35_vm0, %v28_v4  ;;  %s1364_s1 = smov 15   ;;  %s1365_s3 = smov 16   ;;  %v127_v20 = vld [vmem:[%s1744_s4] sm:$0xff]  ;;  %v1485_v25 = vld [vmem:[%s1745_s5 + $0x8] sm:$0xff]  ;;  %vm161_vm3 = vcmask 1045504   ;;  %vm157_vm4 = vcmask 48128  }
   0x6   :  { %1335 = vset.pattern.permute.xlu0 %v1362_v6  ;;  %s1366_s9 = smov 1   ;;  %s1367_s10 = smov 113   ;;  %v1480_v24 = vand.u32 127, %v141_v23  ;;  %v149_v27 = vperm.slane %v1485_v25, 0  ;;  %v272_v28 = vperm.slane %v1485_v25, 1  ;;  %v156_v33 = vld [vmem:[%s1742_s2] sm:$0xff] }
   0x7   :  { %32 = vperm.xlu0 %1335, %v29_v5   ;;  %s1368_s11 = smov 127   ;;  %s1369_s12 = smov 112   ;;  %v1504_v34 = vld [vmem:[%s1745_s5 + $0x10] sm:$0xff]  ;;  %v1253_v42 = vld [vmem:[%s1742_s2 + $0x8] sm:$0xff]  ;;  %v1520_v43 = vld [vmem:[%s1745_s5] sm:$0xff]  ;;  %v394_v57 = vperm.slane %v1485_v25, 2 }
   0x8   :  { %s1370_s13 = smov 111   ;;  %vm266_vm1 = vcmp.lt.s32.totalorder %v1480_v24, 16  ;;  %vm143_vm2 = vcmp.lt.s32.totalorder %v1480_v24, 17  ;;  %v150_v36 = vperm.slane %v1504_v34, 0  ;;  %v1525_v44 = vld [vmem:[%s1745_s5 + $0x18] sm:$0xff]  ;;  %v148_v45 = vperm.slane %v1520_v43, 0 }
   0x9   :  { %v151_v46 = vperm.slane %v1525_v44, 0  ;;  %v273_v47 = vperm.slane %v1504_v34, 1  ;;  %vm388_vm5 = vcmp.lt.s32.totalorder %v1480_v24, 15  ;;  %v1262_v62 = vld [vmem:[%s1742_s2 + $0x10] sm:$0xff]  ;;  %v271_v4 = vperm.slane %v1520_v43, 1  ;;  %s1232_s16 = sshll.u32 %s1746_s6, 4  ;;  %s1233_s16 = int_to_ptr.hbm [resolvable:$true] %s1232_s16 }
   0xa   :  { %v274_v5 = vperm.slane %v1525_v44, 1  ;;  %v393_v6 = vperm.slane %v1520_v43, 2  ;;  %vm510_vm6 = vcmp.lt.s32.totalorder %v1480_v24, 1  ;;  %vm733_vm7 = vcmp.lt.s32.totalorder %v1480_v24, 127 }
   0xb   :  { %vm855_vm8 = vcmp.lt.s32.totalorder %v1480_v24, 113  ;;  %vm977_vm9 = vcmp.lt.s32.totalorder %v1480_v24, 112  ;;  %vm1099_vm10 = vcmp.lt.s32.totalorder %v1480_v24, 111 }
  0x79   :  { %v33_v7 = vpop.permute.xlu0 %32 }
  0x81   :  { %v56_v8 = vpop.f32.mrf.mxu0  ;;  %v76_v9 = vpop.f32.mrf.mxu1 }
  0x82   :  { %v57_v10 = vadd.f32 %v56_v8, %v33_v7  ;;  %v77_v11 = vadd.f32 %v76_v9, %v33_v7 }
  0x84   :  { %v1437_v12 = vmax.f32 %v57_v10, 0.0  ;;  %v1439_v13 = vmax.f32 %v77_v11, 0.0 }
  0x86   :  { %135 = vrot.lane.b32.xlu0 %v1439_v13, %s1363_s0  ;;  %133 = vrot.lane.b32.xlu2 %v1437_v12, %s1363_s0 }
  0x88   :  { %v96_v14 = vpop.f32.mrf.mxu2  ;;  %v116_v17 = vpop.f32.mrf.mxu3 }
  0x89   :  { %v97_v15 = vadd.f32 %v96_v14, %v33_v7  ;;  %v117_v18 = vadd.f32 %v116_v17, %v33_v7 }
  0x8b   :  { %v1443_v16 = vmax.f32 %v97_v15, 0.0  ;;  %v1448_v19 = vmax.f32 %v117_v18, 0.0  ;;  %v395_v18 = vperm.slane %v1504_v34, 2 }
  0x8d   :  { %137 = vrot.lane.b32.xlu1 %v1443_v16, %s1363_s0 }
  0x8e   :  { %382 = vrot.lane.b32.xlu0 %v1439_v13, %s1364_s1  ;;  %260 = vrot.lane.b32.xlu2 %v1439_v13, %s1365_s3 }
  0x95   :  { %139 = vrot.lane.b32.xlu1 %v1448_v19, %s1363_s0 }
  0x96   :  { %262 = vrot.lane.b32.xlu0 %v1443_v16, %s1365_s3  ;;  %258 = vrot.lane.b32.xlu2 %v1437_v12, %s1365_s3 }
  0x9d   :  { %504 = vrot.lane.b32.xlu1 %v1439_v13, %s1366_s9 }
  0x9e   :  { %380 = vrot.lane.b32.xlu0 %v1437_v12, %s1364_s1  ;;  %386 = vrot.lane.b32.xlu2 %v1448_v19, %s1364_s1 }
  0xa5   :  { %264 = vrot.lane.b32.xlu1 %v1448_v19, %s1365_s3 }
  0xa6   :  { %508 = vrot.lane.b32.xlu0 %v1448_v19, %s1366_s9  ;;  %506 = vrot.lane.b32.xlu2 %v1443_v16, %s1366_s9 }
  0xad   :  { %384 = vrot.lane.b32.xlu1 %v1443_v16, %s1364_s1 }
  0xae   :  { %847 = vrot.lane.b32.xlu0 %v1437_v12, %s1367_s10  ;;  %725 = vrot.lane.b32.xlu2 %v1437_v12, %s1368_s11 }
  0xb5   :  { %502 = vrot.lane.b32.xlu1 %v1437_v12, %s1366_s9 }
  0xb6   :  { %729 = vrot.lane.b32.xlu0 %v1443_v16, %s1368_s11  ;;  %727 = vrot.lane.b32.xlu2 %v1439_v13, %s1368_s11 }
  0xbd   :  { %969 = vrot.lane.b32.xlu1 %v1437_v12, %s1369_s12 }
  0xbe   :  { %849 = vrot.lane.b32.xlu0 %v1439_v13, %s1367_s10  ;;  %853 = vrot.lane.b32.xlu2 %v1448_v19, %s1367_s10 }
  0xc5   :  { %731 = vrot.lane.b32.xlu1 %v1448_v19, %s1368_s11 }
  0xc6   :  { %975 = vrot.lane.b32.xlu0 %v1448_v19, %s1369_s12  ;;  %973 = vrot.lane.b32.xlu2 %v1443_v16, %s1369_s12 }
  0xcd   :  { %851 = vrot.lane.b32.xlu1 %v1443_v16, %s1367_s10 }
  0xce   :  { %1095 = vrot.lane.b32.xlu0 %v1443_v16, %s1370_s13  ;;  %1091 = vrot.lane.b32.xlu2 %v1437_v12, %s1370_s13 }
  0xd5   :  { %971 = vrot.lane.b32.xlu1 %v1439_v13, %s1369_s12 }
  0xd6   :  { %130 = vperm.xlu0 %1335, %v127_v20   ;;  %1093 = vrot.lane.b32.xlu2 %v1439_v13, %s1370_s13  ;;  %v396_v20 = vperm.slane %v1525_v44, 2 }
  0xdd   :  { %1097 = vrot.lane.b32.xlu1 %v1448_v19, %s1370_s13 }
  0xe0   :  { %v134_v21 = vpop.permute.xlu2 %133 }
  0xe8   :  { %v261_v22 = vpop.permute.xlu2 %260 }
  0xf0   :  { %v1488_v26 = vpop.permute.xlu2 %258 }
  0xf1   :  { %v269_v30 = vsel %vm266_vm1, %v1488_v26, %v261_v22 }
  0xf2   :  { %v276_v35 = vmul.f32 %v272_v28, %v269_v30 }
  0xf8   :  { %v136_v29 = vpop.permute.xlu0 %135  ;;  %v1510_v38 = vpop.permute.xlu2 %386 }
  0xf9   :  { %v146_v31 = vsel %vm143_vm2, %v134_v21, %v136_v29 }
  0xfa   :  { %v153_v32 = vmul.f32 %v149_v27, %v146_v31  ;;  %v518_v27 = vperm.slane %v1525_v44, 3 }
  0xfc   :  { %1247 = vmatpush.msk.msrb.mxu1 %vm161_vm3, %v153_v32 }
  0xfd   :  { %1248 = vmatmul.msk.f32.vlgmr.msrb.gmra.mxu1 %vm157_vm4, %v156_v33 }
  0xfe   :  { %1256 = vmatpush.msk.msra.mxu1 %vm161_vm3, %v276_v35 }
  0xff   :  { %v138_v37 = vpop.permute.xlu1 %137 }
 0x100   :  { %v145_v39 = vsel %vm143_vm2, %v136_v29, %v138_v37  ;;  %v383_v40 = vpop.permute.xlu0 %382  ;;  %v507_v55 = vpop.permute.xlu2 %506 }
 0x101   :  { %v154_v41 = vmul.f32 %v150_v36, %v145_v39 }
 0x103   :  { %1249 = vmatpush.msk.msrb.mxu2 %vm161_vm3, %v154_v41 }
 0x104   :  { %1250 = vmatmul.msk.f32.vlgmr.msrb.gmra.mxu2 %vm157_vm4, %v156_v33 }
 0x105   :  { %1257 = vmatmul.msk.f32.vlgmr.msra.gmra.mxu1 %vm157_vm4, %v1253_v42 }
 0x107   :  { %v140_v48 = vpop.permute.xlu1 %139 }
 0x108   :  { %v144_v49 = vsel %vm143_vm2, %v138_v37, %v140_v48  ;;  %v147_v50 = vsel %vm143_vm2, %v140_v48, %v134_v21  ;;  %v263_v51 = vpop.permute.xlu0 %262  ;;  %v1552_v63 = vpop.permute.xlu2 %725  ;;  %v515_v37 = vperm.slane %v1520_v43, 3 }
 0x109   :  { %v152_v52 = vmul.f32 %v148_v45, %v147_v50  ;;  %v155_v53 = vmul.f32 %v151_v46, %v144_v49  ;;  %v268_v54 = vsel %vm266_vm1, %v261_v22, %v263_v51  ;;  %v517_v22 = vperm.slane %v1504_v34, 3 }
 0x10a   :  { %v277_v56 = vmul.f32 %v273_v47, %v268_v54  ;;  %v738_v47 = vperm.slane %v1520_v43, 4 }
 0x10b   :  { %1245 = vmatpush.msk.msrb.mxu0 %vm161_vm3, %v152_v52  ;;  %1251 = vmatpush.msk.msrb.mxu3 %vm161_vm3, %v155_v53  ;;  %v860_v53 = vperm.slane %v1520_v43, 5 }
 0x10c   :  { %1246 = vmatmul.msk.f32.vlgmr.msrb.gmra.mxu0 %vm157_vm4, %v156_v33  ;;  %1252 = vmatmul.msk.f32.vlgmr.msrb.gmra.mxu3 %vm157_vm4, %v156_v33 }
 0x10d   :  { %1258 = vmatpush.msk.msra.mxu2 %vm161_vm3, %v277_v56 }
 0x10e   :  { %1259 = vmatmul.msk.f32.vlgmr.msra.gmra.mxu2 %vm157_vm4, %v1253_v42 }
 0x10f   :  { %v505_v58 = vpop.permute.xlu1 %504 }
 0x110   :  { %v381_v59 = vpop.permute.xlu0 %380  ;;  %v728_v21 = vpop.permute.xlu2 %727 }
 0x111   :  { %v391_v60 = vsel %vm388_vm5, %v381_v59, %v383_v40  ;;  %v392_v8 = vsel %vm388_vm5, %v1510_v38, %v381_v59  ;;  %v736_v50 = vsel %vm733_vm7, %v1552_v63, %v728_v21  ;;  %v741_v59 = vperm.slane %v1525_v44, 4 }
 0x112   :  { %v398_v61 = vmul.f32 %v394_v57, %v391_v60  ;;  %v397_v17 = vmul.f32 %v393_v6, %v392_v8  ;;  %v742_v52 = vmul.f32 %v738_v47, %v736_v50 }
 0x114   :  { %1265 = vmatpush.msk.msrb.mxu1 %vm161_vm3, %v398_v61  ;;  %v985_v61 = vperm.slane %v1525_v44, 6 }
 0x115   :  { %1266 = vmatmul.msk.f32.vlgmr.msrb.gmra.mxu1 %vm157_vm4, %v1262_v62 }
 0x117   :  { %v265_v7 = vpop.permute.xlu1 %264 }
 0x118   :  { %v267_v9 = vsel %vm266_vm1, %v263_v51, %v265_v7  ;;  %v270_v10 = vsel %vm266_vm1, %v265_v7, %v1488_v26  ;;  %v509_v11 = vpop.permute.xlu0 %508  ;;  %v512_v26 = vsel %vm510_vm6, %v505_v58, %v507_v55  ;;  %v1603_v41 = vpop.permute.xlu2 %853 }
 0x119   :  { %v275_v14 = vmul.f32 %v271_v4, %v270_v10  ;;  %v278_v15 = vmul.f32 %v274_v5, %v267_v9  ;;  %v511_v31 = vsel %vm510_vm6, %v507_v55, %v509_v11  ;;  %v521_v35 = vmul.f32 %v517_v22, %v512_v26 }
 0x11a   :  { %v522_v36 = vmul.f32 %v518_v27, %v511_v31  ;;  %v982_v31 = vperm.slane %v1520_v43, 6 }
 0x11b   :  { %1254 = vmatpush.msk.msra.mxu0 %vm161_vm3, %v275_v14  ;;  %1260 = vmatpush.msk.msra.mxu3 %vm161_vm3, %v278_v15 }
 0x11c   :  { %1255 = vmatmul.msk.f32.vlgmr.msra.gmra.mxu0 %vm157_vm4, %v1253_v42  ;;  %1261 = vmatmul.msk.f32.vlgmr.msra.gmra.mxu3 %vm157_vm4, %v1253_v42 }
 0x11d   :  { %1263 = vmatpush.msk.msrb.mxu0 %vm161_vm3, %v397_v17  ;;  %v861_v17 = vperm.slane %v1485_v25, 5 }
 0x11f   :  { %v385_v23 = vpop.permute.xlu1 %384 }
 0x120   :  { %v389_v28 = vsel %vm388_vm5, %v385_v23, %v1510_v38  ;;  %v390_v29 = vsel %vm388_vm5, %v383_v40, %v385_v23  ;;  %v1584_v30 = vpop.permute.xlu0 %847  ;;  %v516_v38 = vperm.slane %v1485_v25, 3  ;;  %v739_v40 = vperm.slane %v1485_v25, 4 }
 0x121   :  { %v399_v32 = vmul.f32 %v395_v18, %v390_v29  ;;  %v400_v33 = vmul.f32 %v396_v20, %v389_v28  ;;  %v859_v7 = vsel %vm855_vm8, %v1603_v41, %v1584_v30  ;;  %v862_v18 = vperm.slane %v1504_v34, 5  ;;  %v1298_v29 = vld [vmem:[%s1742_s2 + $0x30] sm:$0xff] }
 0x123   :  { %1267 = vmatpush.msk.msrb.mxu2 %vm161_vm3, %v399_v32  ;;  %1269 = vmatpush.msk.msrb.mxu3 %vm161_vm3, %v400_v33  ;;  %v983_v32 = vperm.slane %v1485_v25, 6 }
 0x124   :  { %1264 = vmatmul.msk.f32.vlgmr.msrb.gmra.mxu0 %vm157_vm4, %v1262_v62  ;;  %1268 = vmatmul.msk.f32.vlgmr.msrb.gmra.mxu2 %vm157_vm4, %v1262_v62 }
 0x125   :  { %1270 = vmatmul.msk.f32.vlgmr.msrb.gmra.mxu3 %vm157_vm4, %v1262_v62  ;;  %1276 = vmatpush.msk.msra.mxu2 %vm161_vm3, %v521_v35  ;;  %v863_v62 = vperm.slane %v1525_v44, 5 }
 0x126   :  { %1278 = vmatpush.msk.msra.mxu3 %vm161_vm3, %v522_v36 }
 0x127   :  { %1285 = vmatpush.msk.msrb.mxu2 %vm161_vm3, %v1443_v16  ;;  %v503_v39 = vpop.permute.xlu1 %502 }
 0x128   :  { %1287 = vmatpush.msk.msrb.mxu3 %vm161_vm3, %v1448_v19  ;;  %v513_v42 = vsel %vm510_vm6, %v503_v39, %v505_v58  ;;  %v514_v45 = vsel %vm510_vm6, %v509_v11, %v503_v39  ;;  %v730_v46 = vpop.permute.xlu0 %729  ;;  %v1271_v19 = vld [vmem:[%s1742_s2 + $0x18] sm:$0xff]  ;;  %v740_v58 = vperm.slane %v1504_v34, 4  ;;  %v1289_v11 = vld [vmem:[%s1742_s2 + $0x28] sm:$0xff] }
 0x129   :  { %v519_v16 = vmul.f32 %v515_v37, %v514_v45  ;;  %v520_v48 = vmul.f32 %v516_v38, %v513_v42  ;;  %v735_v49 = vsel %vm733_vm7, %v728_v21, %v730_v46  ;;  %v984_v21 = vperm.slane %v1504_v34, 6 }
 0x12a   :  { %v743_v51 = vmul.f32 %v739_v40, %v735_v49  ;;  %v1104_v37 = vperm.slane %v1520_v43, 7  ;;  %v1105_v38 = vperm.slane %v1485_v25, 7  ;;  %v1307_v43 = vld [vmem:[%s1742_s2 + $0x38] sm:$0xff] }
 0x12b   :  { %1272 = vmatpush.msk.msra.mxu0 %vm161_vm3, %v519_v16  ;;  %1274 = vmatpush.msk.msra.mxu1 %vm161_vm3, %v520_v48  ;;  %v1106_v16 = vperm.slane %v1504_v34, 7  ;;  %v1107_v48 = vperm.slane %v1525_v44, 7 }
 0x12c   :  { %1273 = vmatmul.msk.f32.vlgmr.msra.gmra.mxu0 %vm157_vm4, %v1271_v19  ;;  %1275 = vmatmul.msk.f32.vlgmr.msra.gmra.mxu1 %vm157_vm4, %v1271_v19 }
 0x12d   :  { %1277 = vmatmul.msk.f32.vlgmr.msra.gmra.mxu2 %vm157_vm4, %v1271_v19  ;;  %1279 = vmatmul.msk.f32.vlgmr.msra.gmra.mxu3 %vm157_vm4, %v1271_v19 }
 0x12e   :  { %1281 = vmatpush.msk.msrb.mxu0 %vm161_vm3, %v1437_v12  ;;  %1283 = vmatpush.msk.msrb.mxu1 %vm161_vm3, %v1439_v13  ;;  %v1280_v12 = vld [vmem:[%s1742_s2 + $0x20] sm:$0xff]  ;;  %v974_v13 = vpop.permute.xlu2 %973 }
 0x12f   :  { %v1631_v54 = vpop.permute.xlu1 %969 }
 0x130   :  { %1290 = vmatpush.msk.msra.mxu0 %vm161_vm3, %v742_v52  ;;  %1292 = vmatpush.msk.msra.mxu1 %vm161_vm3, %v743_v51  ;;  %v850_v55 = vpop.permute.xlu0 %849 }
 0x131   :  { %v858_v56 = vsel %vm855_vm8, %v1584_v30, %v850_v55 }
 0x132   :  { %v864_v57 = vmul.f32 %v860_v53, %v858_v56  ;;  %v1316_v53 = vld [vmem:[%s1742_s2 + $0x40] sm:$0xff]  ;;  %s1371_s2 = smov [#allocation2]  }
 0x133   :  { %s1230_s13 = sshll.u32 %s1371_s2, 4  ;;  %s1231_s13 = int_to_ptr.vmem [resolvable:$true] %s1230_s13 }
 0x134   :  { %1282 = vmatmul.msk.f32.vlgmr.msrb.gmra.mxu0 %vm157_vm4, %v1280_v12  ;;  %1284 = vmatmul.msk.f32.vlgmr.msrb.gmra.mxu1 %vm157_vm4, %v1280_v12 }
 0x135   :  { %1286 = vmatmul.msk.f32.vlgmr.msrb.gmra.mxu2 %vm157_vm4, %v1280_v12  ;;  %1288 = vmatmul.msk.f32.vlgmr.msrb.gmra.mxu3 %vm157_vm4, %v1280_v12 }
 0x136   :  { %1299 = vmatpush.msk.msrb.mxu0 %vm161_vm3, %v864_v57  ;;  %v1092_v15 = vpop.permute.xlu2 %1091 }
 0x137   :  { %v732_v60 = vpop.permute.xlu1 %731 }
 0x138   :  { %v734_v4 = vsel %vm733_vm7, %v730_v46, %v732_v60  ;;  %v737_v5 = vsel %vm733_vm7, %v732_v60, %v1552_v63  ;;  %v976_v6 = vpop.permute.xlu0 %975  ;;  %v867_v63 = vmul.f32 %v863_v62, %v859_v7 }
 0x139   :  { %v744_v8 = vmul.f32 %v740_v58, %v734_v4  ;;  %v745_v9 = vmul.f32 %v741_v59, %v737_v5  ;;  %v981_v10 = vsel %vm977_vm9, %v976_v6, %v1631_v54  ;;  %v978_v26 = vsel %vm977_vm9, %v974_v13, %v976_v6 }
 0x13a   :  { %v989_v14 = vmul.f32 %v985_v61, %v981_v10  ;;  %v988_v30 = vmul.f32 %v984_v21, %v978_v26 }
 0x13b   :  { %1294 = vmatpush.msk.msra.mxu2 %vm161_vm3, %v744_v8  ;;  %1296 = vmatpush.msk.msra.mxu3 %vm161_vm3, %v745_v9 }
 0x13c   :  { %1291 = vmatmul.msk.f32.vlgmr.msra.gmra.mxu0 %vm157_vm4, %v1289_v11  ;;  %1293 = vmatmul.msk.f32.vlgmr.msra.gmra.mxu1 %vm157_vm4, %v1289_v11 }
 0x13d   :  { %1295 = vmatmul.msk.f32.vlgmr.msra.gmra.mxu2 %vm157_vm4, %v1289_v11  ;;  %1297 = vmatmul.msk.f32.vlgmr.msra.gmra.mxu3 %vm157_vm4, %v1289_v11 }
 0x13e   :  { %1305 = vmatpush.msk.msrb.mxu3 %vm161_vm3, %v867_v63  ;;  %v1094_v33 = vpop.permute.xlu2 %1093 }
 0x13f   :  { %v852_v20 = vpop.permute.xlu1 %851 }
 0x140   :  { %1314 = vmatpush.msk.msra.mxu3 %vm161_vm3, %v989_v14  ;;  %v856_v22 = vsel %vm855_vm8, %v852_v20, %v1603_v41  ;;  %v857_v23 = vsel %vm855_vm8, %v850_v55, %v852_v20  ;;  %v1096_v35 = vpop.permute.xlu0 %1095  ;;  %v1102_v41 = vsel %vm1099_vm10, %v1092_v15, %v1094_v33 }
 0x141   :  { %v865_v27 = vmul.f32 %v861_v17, %v857_v23  ;;  %v866_v28 = vmul.f32 %v862_v18, %v856_v22  ;;  %v1101_v42 = vsel %vm1099_vm10, %v1094_v33, %v1096_v35  ;;  %v1108_v25 = vmul.f32 %v1104_v37, %v1102_v41 }
 0x142   :  { %v1109_v47 = vmul.f32 %v1105_v38, %v1101_v42 }
 0x143   :  { %1301 = vmatpush.msk.msrb.mxu1 %vm161_vm3, %v865_v27  ;;  %1303 = vmatpush.msk.msrb.mxu2 %vm161_vm3, %v866_v28 }
 0x144   :  { %1300 = vmatmul.msk.f32.vlgmr.msrb.gmra.mxu0 %vm157_vm4, %v1298_v29  ;;  %1302 = vmatmul.msk.f32.vlgmr.msrb.gmra.mxu1 %vm157_vm4, %v1298_v29 }
 0x145   :  { %1304 = vmatmul.msk.f32.vlgmr.msrb.gmra.mxu2 %vm157_vm4, %v1298_v29  ;;  %1306 = vmatmul.msk.f32.vlgmr.msrb.gmra.mxu3 %vm157_vm4, %v1298_v29 }
 0x146   :  { %1312 = vmatpush.msk.msra.mxu2 %vm161_vm3, %v988_v30 }
 0x147   :  { %v972_v36 = vpop.permute.xlu1 %971 }
 0x148   :  { %v979_v39 = vsel %vm977_vm9, %v972_v36, %v974_v13  ;;  %v980_v40 = vsel %vm977_vm9, %v1631_v54, %v972_v36  ;;  %v131_v14 = vpop.permute.xlu0 %130 }
 0x149   :  { %v986_v45 = vmul.f32 %v982_v31, %v980_v40  ;;  %v987_v46 = vmul.f32 %v983_v32, %v979_v39 }
 0x14b   :  { %1308 = vmatpush.msk.msra.mxu0 %vm161_vm3, %v986_v45  ;;  %1310 = vmatpush.msk.msra.mxu1 %vm161_vm3, %v987_v46 }
 0x14c   :  { %1309 = vmatmul.msk.f32.vlgmr.msra.gmra.mxu0 %vm157_vm4, %v1307_v43  ;;  %1311 = vmatmul.msk.f32.vlgmr.msra.gmra.mxu1 %vm157_vm4, %v1307_v43 }
 0x14d   :  { %1313 = vmatmul.msk.f32.vlgmr.msra.gmra.mxu2 %vm157_vm4, %v1307_v43  ;;  %1315 = vmatmul.msk.f32.vlgmr.msra.gmra.mxu3 %vm157_vm4, %v1307_v43 }
 0x14e   :  { %1317 = vmatpush.msk.msrb.mxu0 %vm161_vm3, %v1108_v25  ;;  %1319 = vmatpush.msk.msrb.mxu1 %vm161_vm3, %v1109_v47 }
 0x14f   :  { %v1098_v49 = vpop.permute.xlu1 %1097 }
 0x150   :  { %v1100_v19 = vsel %vm1099_vm10, %v1096_v35, %v1098_v49  ;;  %v1103_v50 = vsel %vm1099_vm10, %v1098_v49, %v1092_v15 }
 0x151   :  { %v1110_v51 = vmul.f32 %v1106_v16, %v1100_v19  ;;  %v1111_v52 = vmul.f32 %v1107_v48, %v1103_v50 }
 0x153   :  { %1321 = vmatpush.msk.msrb.mxu2 %vm161_vm3, %v1110_v51  ;;  %1323 = vmatpush.msk.msrb.mxu3 %vm161_vm3, %v1111_v52 }
 0x154   :  { %1318 = vmatmul.msk.f32.vlgmr.msrb.gmra.mxu0 %vm157_vm4, %v1316_v53  ;;  %1320 = vmatmul.msk.f32.vlgmr.msrb.gmra.mxu1 %vm157_vm4, %v1316_v53 }
 0x155   :  { %1322 = vmatmul.msk.f32.vlgmr.msrb.gmra.mxu2 %vm157_vm4, %v1316_v53  ;;  %1324 = vmatmul.msk.f32.vlgmr.msrb.gmra.mxu3 %vm157_vm4, %v1316_v53 }
 0x17a   :  { %v211_v24 = vpop.f32.mrf.mxu1 }
 0x17b   :  { %v255_v20 = vadd.f32 %v211_v24, %v131_v14 }
 0x182   :  { %v333_v55 = vpop.f32.mrf.mxu1 }
 0x183   :  { %v377_v22 = vadd.f32 %v333_v55, %v255_v20 }
 0x187   :  { %v231_v44 = vpop.f32.mrf.mxu2 }
 0x188   :  { %v256_v32 = vadd.f32 %v231_v44, %v131_v14 }
 0x189   :  { %v191_v34 = vpop.f32.mrf.mxu0 }
 0x18a   :  { %v254_v21 = vadd.f32 %v191_v34, %v131_v14 }
 0x18f   :  { %v251_v54 = vpop.f32.mrf.mxu3 }
 0x190   :  { %v257_v33 = vadd.f32 %v251_v54, %v131_v14 }
 0x191   :  { %v353_v12 = vpop.f32.mrf.mxu2 }
 0x192   :  { %v455_v57 = vpop.f32.mrf.mxu1  ;;  %v378_v39 = vadd.f32 %v353_v12, %v256_v32 }
 0x193   :  { %v499_v26 = vadd.f32 %v455_v57, %v377_v22 }
 0x199   :  { %v313_v56 = vpop.f32.mrf.mxu0 }
 0x19a   :  { %v376_v23 = vadd.f32 %v313_v56, %v254_v21 }
 0x19f   :  { %v373_v13 = vpop.f32.mrf.mxu3 }
 0x1a0   :  { %v379_v40 = vadd.f32 %v373_v13, %v257_v33 }
 0x1a1   :  { %v435_v58 = vpop.f32.mrf.mxu0 }
 0x1a2   :  { %v498_v27 = vadd.f32 %v435_v58, %v376_v23 }
 0x1a7   :  { %v475_v59 = vpop.f32.mrf.mxu2 }
 0x1a8   :  { %v495_v60 = vpop.f32.mrf.mxu3  ;;  %v500_v45 = vadd.f32 %v475_v59, %v378_v39 }
 0x1a9   :  { %v557_v61 = vpop.f32.mrf.mxu0  ;;  %v577_v62 = vpop.f32.mrf.mxu1  ;;  %v501_v46 = vadd.f32 %v495_v60, %v379_v40 }
 0x1aa   :  { %v620_v28 = vadd.f32 %v557_v61, %v498_v27  ;;  %v621_v29 = vadd.f32 %v577_v62, %v499_v26 }
 0x1b0   :  { %v597_v4 = vpop.f32.mrf.mxu2  ;;  %v617_v5 = vpop.f32.mrf.mxu3 }
 0x1b1   :  { %v658_v6 = vpop.f32.mrf.mxu0  ;;  %v678_v7 = vpop.f32.mrf.mxu1  ;;  %v622_v47 = vadd.f32 %v597_v4, %v500_v45  ;;  %v623_v16 = vadd.f32 %v617_v5, %v501_v46 }
 0x1b2   :  { %v721_v37 = vadd.f32 %v658_v6, %v620_v28  ;;  %v722_v38 = vadd.f32 %v678_v7, %v621_v29 }
 0x1b8   :  { %v698_v8 = vpop.f32.mrf.mxu2  ;;  %v718_v9 = vpop.f32.mrf.mxu3 }
 0x1b9   :  { %v780_v10 = vpop.f32.mrf.mxu0  ;;  %v800_v11 = vpop.f32.mrf.mxu1  ;;  %v723_v51 = vadd.f32 %v698_v8, %v622_v47  ;;  %v724_v52 = vadd.f32 %v718_v9, %v623_v16 }
 0x1ba   :  { %v843_v41 = vadd.f32 %v780_v10, %v721_v37  ;;  %v844_v42 = vadd.f32 %v800_v11, %v722_v38 }
 0x1c0   :  { %v820_v63 = vpop.f32.mrf.mxu2  ;;  %v840_v15 = vpop.f32.mrf.mxu3 }
 0x1c1   :  { %v902_v17 = vpop.f32.mrf.mxu0  ;;  %v922_v18 = vpop.f32.mrf.mxu1  ;;  %v845_v54 = vadd.f32 %v820_v63, %v723_v51  ;;  %v846_v55 = vadd.f32 %v840_v15, %v724_v52 }
 0x1c2   :  { %v965_v43 = vadd.f32 %v902_v17, %v843_v41  ;;  %v966_v25 = vadd.f32 %v922_v18, %v844_v42 }
 0x1c8   :  { %v942_v30 = vpop.f32.mrf.mxu2  ;;  %v962_v31 = vpop.f32.mrf.mxu3 }
 0x1c9   :  { %v1024_v35 = vpop.f32.mrf.mxu0  ;;  %v1044_v36 = vpop.f32.mrf.mxu1  ;;  %v967_v13 = vadd.f32 %v942_v30, %v845_v54  ;;  %v968_v57 = vadd.f32 %v962_v31, %v846_v55 }
 0x1ca   :  { %v1087_v48 = vadd.f32 %v1024_v35, %v965_v43  ;;  %v1088_v49 = vadd.f32 %v1044_v36, %v966_v25 }
 0x1d0   :  { %v1064_v19 = vpop.f32.mrf.mxu2  ;;  %v1084_v50 = vpop.f32.mrf.mxu3 }
 0x1d1   :  { %v1146_v53 = vpop.f32.mrf.mxu0  ;;  %v1166_v24 = vpop.f32.mrf.mxu1  ;;  %v1089_v60 = vadd.f32 %v1064_v19, %v967_v13  ;;  %v1090_v61 = vadd.f32 %v1084_v50, %v968_v57 }
 0x1d2   :  { %v1209_v34 = vadd.f32 %v1146_v53, %v1087_v48  ;;  %v1210_v44 = vadd.f32 %v1166_v24, %v1088_v49 }
 0x1d4   :  { %v1213_v56 = vadd.f32 %v1209_v34, %v1410_v0  ;;  %v1214_v12 = vadd.f32 %v1210_v44, %v1415_v1 }
 0x1d6   :  { %v1217_v58 = vmax.f32 %v1213_v56, 0.0  ;;  %v1218_v59 = vmax.f32 %v1214_v12, 0.0 }
 0x1d8   :  { %1221 = vst [vmem:[#allocation2] sm:$0xff] %v1217_v58  ;;  %v1186_v62 = vpop.f32.mrf.mxu2  ;;  %v1206_v4 = vpop.f32.mrf.mxu3 }
 0x1d9   :  { %1222 = vst [vmem:[#allocation2 + $0x8] sm:$0xff] %v1218_v59  ;;  %v1211_v5 = vadd.f32 %v1186_v62, %v1089_v60  ;;  %v1212_v6 = vadd.f32 %v1206_v4, %v1090_v61 }
 0x1db   :  { %v1215_v7 = vadd.f32 %v1211_v5, %v1420_v2  ;;  %v1216_v8 = vadd.f32 %v1212_v6, %v1427_v3 }
 0x1dd   :  { %v1219_v0 = vmax.f32 %v1215_v7, 0.0  ;;  %v1220_v1 = vmax.f32 %v1216_v8, 0.0 }
 0x1df   :  { %1223 = vst [vmem:[#allocation2 + $0x10] sm:$0xff] %v1219_v0 }
 0x1e0   :  { %1224 = vst [vmem:[#allocation2 + $0x18] sm:$0xff] %v1220_v1 }
 0x1e1   :  { %1235 = dma.vmem_to_hbm [thread:$0]  %s1231_s13, 512, %s1233_s16, [#allocation3]  }
 0x1e2   :  { %1360 = dma.done.wait [#allocation3], 512  }
 0x1e3   :  { %1361 = vsyncadd [#allocation3], 4294966784 }
 0x1e4   :  { %1240 = vsyncpa [#allocation3], 1 }

</bundles_post_ra>
